<compile_context>
chip_gen: v7x
topology: tpu7x:2x2x1
jax: 0.10.0
libtpu: 0.0.40
codegen_flags: <defaults>
</compile_context>

<pallas_src>
import jax
import jax.numpy as jnp
from jax.experimental import pallas as pl
from jax.experimental.pallas import tpu as pltpu


def lossnet_mlp_kernel(f_ref, w_ref, b_ref, wl_ref, bl_ref, o_ref):
    n_branches = f_ref.shape[0]
    acc = None
    for i in range(n_branches):          # static unroll over the 3 branches
        # h = relu(f_i @ W_i^T + b_i) -> [B, D]; bf16 operands, f32 accumulation
        h = jnp.dot(f_ref[i], w_ref[i], preferred_element_type=jnp.float32)
        h = jnp.maximum(h + b_ref[i], 0.0)
        # Partial final projection as VPU mul + lane reduce: [B, D] -> [B, 1]
        part = jnp.sum(h * wl_ref[i], axis=-1, keepdims=True)
        acc = part if acc is None else acc + part
    o_ref[...] = (acc + bl_ref[0, 0]).astype(o_ref.dtype)


def _full_vmem_spec(shape):
    # Full-array block (no tiling); grid is empty so index_map takes no args.
    return pl.BlockSpec(shape, lambda: (0,) * len(shape))


def lossnet_mlp_forward(features, fc_weights, fc_biases, lin_w_full, lin_b,
                        interm_dim=128):
    """features: list of [B, C_i]; fc_weights[i]: [C_i, D] (already transposed
    for f @ W); fc_biases[i]: [1, D]; lin_w_full: [len(features)*D, 1];
    lin_b: [1, 1]. Returns [B, 1] float32."""
    n = len(features)
    B = features[0].shape[0]
    # Pad the contraction dim up to a multiple of 128 (300 -> 384) for clean
    # (8,128) tiles; zero padding keeps the math exact.
    c_pad = max(((f.shape[1] + 127) // 128) * 128 for f in features)

    f_packed = jnp.stack(
        [jnp.pad(f, ((0, 0), (0, c_pad - f.shape[1]))) for f in features]
    ).astype(jnp.bfloat16)                                     # [n, B, c_pad]
    w_packed = jnp.stack(
        [jnp.pad(w, ((0, c_pad - w.shape[0]), (0, 0))) for w in fc_weights]
    ).astype(jnp.bfloat16)                                     # [n, c_pad, D]
    b_packed = jnp.stack(fc_biases).astype(jnp.float32)        # [n, 1, D]
    wl_packed = jnp.stack(
        [lin_w_full[i * interm_dim:(i + 1) * interm_dim, :].T for i in range(n)]
    ).astype(jnp.float32)                                      # [n, 1, D]
    bl = jnp.asarray(lin_b, jnp.float32).reshape(1, 1)         # SMEM scalar

    in_specs = [
        _full_vmem_spec(f_packed.shape),
        _full_vmem_spec(w_packed.shape),
        _full_vmem_spec(b_packed.shape),
        _full_vmem_spec(wl_packed.shape),
        pl.BlockSpec(memory_space=pltpu.MemorySpace.SMEM),
    ]
    out_spec = _full_vmem_spec((B, 1))

    return pl.pallas_call(
        lossnet_mlp_kernel,
        out_shape=jax.ShapeDtypeStruct((B, 1), jnp.float32),
        in_specs=in_specs,
        out_specs=out_spec,
    )(f_packed, w_packed, b_packed, wl_packed, bl)


def _init_linear(key, fan_in, fan_out):
    """Deterministic init mimicking PyTorch's default (kaiming-uniform style).

    Returns W stored as [fan_in, fan_out] (already transposed for f @ W) and
    bias [1, fan_out].
    """
    kw, kb = jax.random.split(key)
    bound = 1.0 / jnp.sqrt(jnp.float32(fan_in))
    w = jax.random.uniform(kw, (fan_in, fan_out), jnp.float32, -bound, bound)
    b = jax.random.uniform(kb, (1, fan_out), jnp.float32, -bound, bound)
    return w, b


if __name__ == "__main__":
    num_channels = [300, 300, 300]
    interm_dim = 128
    B = 8

    key = jax.random.PRNGKey(0)
    keys = jax.random.split(key, 8)

    # Inputs: three feature matrices [B, C_i]
    features = [
        jax.random.normal(keys[i], (B, num_channels[i]), jnp.float32)
        for i in range(3)
    ]

    # FC layers (num_channels[i] -> interm_dim)
    fc_weights, fc_biases = [], []
    for i in range(3):
        w, b = _init_linear(keys[3 + i], num_channels[i], interm_dim)
        fc_weights.append(w)
        fc_biases.append(b)

    # Final linear: (3 * interm_dim) -> 1
    lin_w_full, lin_b = _init_linear(keys[6], 3 * interm_dim, 1)

    out = lossnet_mlp_forward(features, fc_weights, fc_biases,
                              lin_w_full, lin_b, interm_dim)
    out = jax.block_until_ready(out)

    # Reference 1: same bf16-rounded inputs, pure-JAX f32 math (tight check of
    # kernel arithmetic, independent of the bf16 cast error).
    outs_bf = [
        jnp.maximum(
            features[i].astype(jnp.bfloat16).astype(jnp.float32)
            @ fc_weights[i].astype(jnp.bfloat16).astype(jnp.float32)
            + fc_biases[i],
            0.0,
        )
        for i in range(3)
    ]
    ref_bf = jnp.concatenate(outs_bf, axis=1) @ lin_w_full + lin_b

    # Reference 2: full-f32 module semantics (loose check, bounds bf16 error).
    outs = [
        jnp.maximum(features[i] @ fc_weights[i] + fc_biases[i], 0.0)
        for i in range(3)
    ]
    ref = jnp.concatenate(outs, axis=1) @ lin_w_full + lin_b

    assert out.shape == (B, 1)
    assert jnp.allclose(out, ref_bf, atol=2e-3, rtol=2e-3), (out, ref_bf)
    assert jnp.allclose(out, ref, atol=5e-2, rtol=5e-2), (out, ref)
    print("KERNEL_OK")
</pallas_src>

<mosaic_0001>
module attributes {stable_mosaic.version = 11 : i64} {
  func.func @lossnet_mlp_kernel(%arg0: memref<3x8x384xbf16, #tpu.memory_space<vmem>>, %arg1: memref<3x384x128xbf16, #tpu.memory_space<vmem>>, %arg2: memref<3x1x128xf32, #tpu.memory_space<vmem>>, %arg3: memref<3x1x128xf32, #tpu.memory_space<vmem>>, %arg4: memref<1x1xf32, #tpu.memory_space<smem>>, %arg5: memref<8x1xf32, #tpu.memory_space<vmem>>) attributes {dimension_semantics = [], scalar_prefetch = 0 : i64, scratch_operands = 0 : i64, tpu.core_type = #tpu.core_type<tc>} {
    %c0 = arith.constant 0 : index
    %c0_0 = arith.constant 0 : index
    %c0_1 = arith.constant 0 : index
    %0 = vector.load %arg0[%c0, %c0_0, %c0_1] : memref<3x8x384xbf16, #tpu.memory_space<vmem>>, vector<1x8x384xbf16>
    %1 = vector.shape_cast %0 : vector<1x8x384xbf16> to vector<8x384xbf16>
    %c0_2 = arith.constant 0 : index
    %c0_3 = arith.constant 0 : index
    %c0_4 = arith.constant 0 : index
    %2 = vector.load %arg1[%c0_2, %c0_3, %c0_4] : memref<3x384x128xbf16, #tpu.memory_space<vmem>>, vector<1x384x128xbf16>
    %3 = vector.shape_cast %2 : vector<1x384x128xbf16> to vector<384x128xbf16>
    %cst = arith.constant dense<0.000000e+00> : vector<8x128xf32>
    %4 = tpu.matmul %1, %3, %cst {dimension_numbers = #tpu.dot_dimension_numbers<[1], [0], [0], [1], [0, 0, 1, 1], [], []>} : vector<8x384xbf16>, vector<384x128xbf16>, vector<8x128xf32> -> vector<8x128xf32>
    %c0_5 = arith.constant 0 : index
    %c0_6 = arith.constant 0 : index
    %c0_7 = arith.constant 0 : index
    %5 = vector.load %arg2[%c0_5, %c0_6, %c0_7] : memref<3x1x128xf32, #tpu.memory_space<vmem>>, vector<1x1x128xf32>
    %6 = vector.shape_cast %5 : vector<1x1x128xf32> to vector<1x128xf32>
    %7 = vector.broadcast %6 : vector<1x128xf32> to vector<8x128xf32>
    %8 = arith.addf %4, %7 : vector<8x128xf32>
    %cst_8 = arith.constant 0.000000e+00 : f32
    %9 = vector.broadcast %cst_8 : f32 to vector<8x128xf32>
    %10 = arith.maximumf %8, %9 : vector<8x128xf32>
    %c0_9 = arith.constant 0 : index
    %c0_10 = arith.constant 0 : index
    %c0_11 = arith.constant 0 : index
    %11 = vector.load %arg3[%c0_9, %c0_10, %c0_11] : memref<3x1x128xf32, #tpu.memory_space<vmem>>, vector<1x1x128xf32>
    %12 = vector.shape_cast %11 : vector<1x1x128xf32> to vector<1x128xf32>
    %13 = vector.broadcast %12 : vector<1x128xf32> to vector<8x128xf32>
    %14 = arith.mulf %10, %13 : vector<8x128xf32>
    %cst_12 = arith.constant dense<0.000000e+00> : vector<8xf32>
    %15 = vector.multi_reduction <add>, %14, %cst_12 [1] : vector<8x128xf32> to vector<8xf32>
    %16 = vector.shape_cast %15 : vector<8xf32> to vector<8x1xf32>
    %c1 = arith.constant 1 : index
    %c0_13 = arith.constant 0 : index
    %c0_14 = arith.constant 0 : index
    %17 = vector.load %arg0[%c1, %c0_13, %c0_14] : memref<3x8x384xbf16, #tpu.memory_space<vmem>>, vector<1x8x384xbf16>
    %18 = vector.shape_cast %17 : vector<1x8x384xbf16> to vector<8x384xbf16>
    %c1_15 = arith.constant 1 : index
    %c0_16 = arith.constant 0 : index
    %c0_17 = arith.constant 0 : index
    %19 = vector.load %arg1[%c1_15, %c0_16, %c0_17] : memref<3x384x128xbf16, #tpu.memory_space<vmem>>, vector<1x384x128xbf16>
    %20 = vector.shape_cast %19 : vector<1x384x128xbf16> to vector<384x128xbf16>
    %cst_18 = arith.constant dense<0.000000e+00> : vector<8x128xf32>
    %21 = tpu.matmul %18, %20, %cst_18 {dimension_numbers = #tpu.dot_dimension_numbers<[1], [0], [0], [1], [0, 0, 1, 1], [], []>} : vector<8x384xbf16>, vector<384x128xbf16>, vector<8x128xf32> -> vector<8x128xf32>
    %c1_19 = arith.constant 1 : index
    %c0_20 = arith.constant 0 : index
    %c0_21 = arith.constant 0 : index
    %22 = vector.load %arg2[%c1_19, %c0_20, %c0_21] : memref<3x1x128xf32, #tpu.memory_space<vmem>>, vector<1x1x128xf32>
    %23 = vector.shape_cast %22 : vector<1x1x128xf32> to vector<1x128xf32>
    %24 = vector.broadcast %23 : vector<1x128xf32> to vector<8x128xf32>
    %25 = arith.addf %21, %24 : vector<8x128xf32>
    %cst_22 = arith.constant 0.000000e+00 : f32
    %26 = vector.broadcast %cst_22 : f32 to vector<8x128xf32>
    %27 = arith.maximumf %25, %26 : vector<8x128xf32>
    %c1_23 = arith.constant 1 : index
    %c0_24 = arith.constant 0 : index
    %c0_25 = arith.constant 0 : index
    %28 = vector.load %arg3[%c1_23, %c0_24, %c0_25] : memref<3x1x128xf32, #tpu.memory_space<vmem>>, vector<1x1x128xf32>
    %29 = vector.shape_cast %28 : vector<1x1x128xf32> to vector<1x128xf32>
    %30 = vector.broadcast %29 : vector<1x128xf32> to vector<8x128xf32>
    %31 = arith.mulf %27, %30 : vector<8x128xf32>
    %cst_26 = arith.constant dense<0.000000e+00> : vector<8xf32>
    %32 = vector.multi_reduction <add>, %31, %cst_26 [1] : vector<8x128xf32> to vector<8xf32>
    %33 = vector.shape_cast %32 : vector<8xf32> to vector<8x1xf32>
    %34 = arith.addf %16, %33 : vector<8x1xf32>
    %c2 = arith.constant 2 : index
    %c0_27 = arith.constant 0 : index
    %c0_28 = arith.constant 0 : index
    %35 = vector.load %arg0[%c2, %c0_27, %c0_28] : memref<3x8x384xbf16, #tpu.memory_space<vmem>>, vector<1x8x384xbf16>
    %36 = vector.shape_cast %35 : vector<1x8x384xbf16> to vector<8x384xbf16>
    %c2_29 = arith.constant 2 : index
    %c0_30 = arith.constant 0 : index
    %c0_31 = arith.constant 0 : index
    %37 = vector.load %arg1[%c2_29, %c0_30, %c0_31] : memref<3x384x128xbf16, #tpu.memory_space<vmem>>, vector<1x384x128xbf16>
    %38 = vector.shape_cast %37 : vector<1x384x128xbf16> to vector<384x128xbf16>
    %cst_32 = arith.constant dense<0.000000e+00> : vector<8x128xf32>
    %39 = tpu.matmul %36, %38, %cst_32 {dimension_numbers = #tpu.dot_dimension_numbers<[1], [0], [0], [1], [0, 0, 1, 1], [], []>} : vector<8x384xbf16>, vector<384x128xbf16>, vector<8x128xf32> -> vector<8x128xf32>
    %c2_33 = arith.constant 2 : index
    %c0_34 = arith.constant 0 : index
    %c0_35 = arith.constant 0 : index
    %40 = vector.load %arg2[%c2_33, %c0_34, %c0_35] : memref<3x1x128xf32, #tpu.memory_space<vmem>>, vector<1x1x128xf32>
    %41 = vector.shape_cast %40 : vector<1x1x128xf32> to vector<1x128xf32>
    %42 = vector.broadcast %41 : vector<1x128xf32> to vector<8x128xf32>
    %43 = arith.addf %39, %42 : vector<8x128xf32>
    %cst_36 = arith.constant 0.000000e+00 : f32
    %44 = vector.broadcast %cst_36 : f32 to vector<8x128xf32>
    %45 = arith.maximumf %43, %44 : vector<8x128xf32>
    %c2_37 = arith.constant 2 : index
    %c0_38 = arith.constant 0 : index
    %c0_39 = arith.constant 0 : index
    %46 = vector.load %arg3[%c2_37, %c0_38, %c0_39] : memref<3x1x128xf32, #tpu.memory_space<vmem>>, vector<1x1x128xf32>
    %47 = vector.shape_cast %46 : vector<1x1x128xf32> to vector<1x128xf32>
    %48 = vector.broadcast %47 : vector<1x128xf32> to vector<8x128xf32>
    %49 = arith.mulf %45, %48 : vector<8x128xf32>
    %cst_40 = arith.constant dense<0.000000e+00> : vector<8xf32>
    %50 = vector.multi_reduction <add>, %49, %cst_40 [1] : vector<8x128xf32> to vector<8xf32>
    %51 = vector.shape_cast %50 : vector<8xf32> to vector<8x1xf32>
    %52 = arith.addf %34, %51 : vector<8x1xf32>
    %c0_41 = arith.constant 0 : index
    %c0_42 = arith.constant 0 : index
    %53 = memref.load %arg4[%c0_41, %c0_42] : memref<1x1xf32, #tpu.memory_space<smem>>
    %54 = vector.broadcast %53 : f32 to vector<8x1xf32>
    %55 = arith.addf %52, %54 : vector<8x1xf32>
    %c0_43 = arith.constant 0 : index
    %c0_44 = arith.constant 0 : index
    %56 = vector.load %arg5[%c0_43, %c0_44] : memref<8x1xf32, #tpu.memory_space<vmem>>, vector<8x1xf32>
    tpu.vector_store %arg5[%c0_43, %c0_44], %55 {strides = array<i32>} : memref<8x1xf32, #tpu.memory_space<vmem>>, vector<8x1xf32>,
    return
  }
}

</mosaic_0001>

<bundles_post_ra>
// kernel: tpu_custom_call.1
= control target key start
LH: loop header
LB: loop body
LE: loop exit
PB: predicated region body
PF: predicated region fallthrough
CT: control target
= control target key end

     0   :  { %11 = vsyncpa [#allocation4], 0  ;;  %s1477_s0 = inlined_call_operand.hbm [shape: bf16[3,8,384], index: 0, kind: input, shape index: {}]   ;;  %s1478_s1 = inlined_call_operand.hbm [shape: bf16[3,384,128], index: 1, kind: input, shape index: {}]   ;;  %s1479_s2 = inlined_call_operand.vmem [shape: f32[3,1,128], index: 2, kind: input, shape index: {}]   ;;  %s1480_s3 = inlined_call_operand.vmem [shape: f32[3,1,128], index: 3, kind: input, shape index: {}]   ;;  %s1481_s4 = inlined_call_operand.<no memory space> [shape: f32[1,1], index: 4, kind: input, shape index: {}]   ;;  %s1482_s5 = inlined_call_operand.vmem [shape: f32[8,1], index: 5, kind: output, shape index: {}]  }
   0x1   :  { %12 = vsyncpa [#allocation6], 0  ;;  %s1361_s18 = smov [#allocation3]   ;;  %s1313_s22 = scalar_lea.hbm %s1477_s0, 576 }
   0x2   :  { %s18_s19 = sshll.u32 %s1361_s18, 4  ;;  %p1314_p0 = scmp.ne.s32.totalorder %s1477_s0, %s1313_s22  ;;  %s19_s19 = int_to_ptr.vmem [resolvable:$true] %s18_s19 }
   0x3   :  { %p1317_p1 = scmp.lt.u32.totalorder %s1313_s22, %s1477_s0 }
   0x5   :  { %p1319_p2 = pnand %p1317_p1, %p1314_p0 }
   0x7   :  { %1322 = shalt.err (!%p1319_p2)
}
   0x8   :  { %s1323_s27 = scalar_lea.vmem %s19_s19, 576  ;;  %p1328_p4 = scmp.lt.s32.totalorder %s19_s19, %s19_s19 }
   0x9   :  { %p1324_p3 = scmp.ne.s32.totalorder %s19_s19, %s1323_s27  ;;  %p1329_p5 = scmp.lt.s32.totalorder %s1323_s27, %s1323_s27 }
   0xb   :  { %p1330_p6 = por %p1329_p5, %p1328_p4 }
   0xd   :  { %p1331_p7 = pnand %p1330_p6, %p1324_p3 }
   0xf   :  { %1334 = shalt.err (!%p1331_p7)
}
  0x10   :  { %s1362_s28 = smov 192   ;;  %s1363_s29 = smov 12  }
  0x11   :  { %24 = dma.hbm_to_vmem [thread:$0]  %s1477_s0, 576, %s19_s19, [#allocation4], %s1362_s28, %s1362_s28, %s1363_s29  }
  0x12   :  { %s1364_s7 = smov [#allocation5]   ;;  %s1335_s11 = scalar_lea.hbm %s1478_s1, 9216 }
  0x13   :  { %s30_s8 = sshll.u32 %s1364_s7, 4  ;;  %p1336_p8 = scmp.ne.s32.totalorder %s1478_s1, %s1335_s11  ;;  %s31_s8 = int_to_ptr.vmem [resolvable:$true] %s30_s8 }
  0x14   :  { %p1339_p9 = scmp.lt.u32.totalorder %s1335_s11, %s1478_s1 }
  0x16   :  { %p1341_p10 = pnand %p1339_p9, %p1336_p8 }
  0x18   :  { %1344 = shalt.err (!%p1341_p10)
}
  0x19   :  { %s1345_s16 = scalar_lea.vmem %s31_s8, 9216  ;;  %p1350_p12 = scmp.lt.s32.totalorder %s31_s8, %s31_s8 }
  0x1a   :  { %p1346_p11 = scmp.ne.s32.totalorder %s31_s8, %s1345_s16  ;;  %p1351_p13 = scmp.lt.s32.totalorder %s1345_s16, %s1345_s16 }
  0x1c   :  { %p1352_p0 = por %p1351_p13, %p1350_p12 }
  0x1e   :  { %p1353_p1 = pnand %p1352_p0, %p1346_p11 }
  0x20   :  { %1356 = shalt.err (!%p1353_p1)
}
  0x21   :  { %s1365_s0 = smov 64   ;;  %s1366_s17 = smov 4  }
  0x22   :  { %36 = dma.hbm_to_vmem [thread:$0]  %s1478_s1, 9216, %s31_s8, [#allocation6], %s1365_s0, %s1365_s0, %s1366_s17  }
  0x23   :  { %1357 = dma.done.wait [#allocation4], 576  }
  0x24   :  { %1358 = vsyncadd [#allocation4], 4294966720 }
  0x25   :  { %1359 = dma.done.wait [#allocation6], 9216  }
  0x26   :  { %1360 = vsyncadd [#allocation6], 4294958080  ;;  %v1367_v0 = vmov 0.0   ;;  %vm1368_vm0 = vmmov 0   ;;  %v1232_v1 = vld [vmem:[#allocation5 + $0x40] sm:$0xff]   ;;  %v1235_v4 = vld [vmem:[#allocation5 + $0x48] sm:$0xff]  }
  0x27   :  { %1164 = vmatprep.subr.bf16.mxu1 %v1367_v0  ;;  %1180 = vmatprep.mubr.msk.bf16.mxu1 %vm1368_vm0, %v1367_v0  ;;  %v1233_v2 = vld [vmem:[#allocation5] sm:$0xff]   ;;  %v1236_v5 = vld [vmem:[#allocation5 + $0x8] sm:$0xff]   ;;  %v1238_v7 = vld [vmem:[#allocation5 + $0x50] sm:$0xff]   ;;  %vm972_vm1 = vcmask 7168  }
  0x28   :  { %1071 = vmatprep.subr.bf16.mxu0 %v1232_v1  ;;  %v1234_v3 = vld [vmem:[#allocation5 + $0x80] sm:$0xff]   ;;  %v1237_v6 = vld [vmem:[#allocation5 + $0x88] sm:$0xff]   ;;  %v1239_v8 = vld [vmem:[#allocation5 + $0x10] sm:$0xff]  }
  0x29   :  { %1072 = vmatpush3.bf16.msra.mxu0 %v1233_v2  ;;  %1165 = vmatpush3.bf16.msra.mxu1 %v1234_v3  ;;  %v1240_v9 = vld [vmem:[#allocation5 + $0x90] sm:$0xff]   ;;  %v1241_v10 = vld [vmem:[#allocation5 + $0x58] sm:$0xff]   ;;  %v1244_v13 = vld [vmem:[#allocation5 + $0x60] sm:$0xff]  }
  0x2a   :  { %1073 = vmatprep.subr.bf16.mxu0 %v1235_v4  ;;  %1166 = vmatprep.subr.bf16.mxu1 %v1367_v0  ;;  %v1242_v11 = vld [vmem:[#allocation5 + $0x18] sm:$0xff]   ;;  %v1245_v14 = vld [vmem:[#allocation5 + $0x20] sm:$0xff]   ;;  %v1247_v16 = vld [vmem:[#allocation5 + $0x68] sm:$0xff]  }
  0x2b   :  { %v1243_v12 = vld [vmem:[#allocation5 + $0x98] sm:$0xff]   ;;  %v1246_v15 = vld [vmem:[#allocation5 + $0xa0] sm:$0xff]   ;;  %v1248_v17 = vld [vmem:[#allocation5 + $0x28] sm:$0xff]  }
  0x2c   :  { %v1249_v18 = vld [vmem:[#allocation5 + $0xa8] sm:$0xff]   ;;  %v1250_v19 = vld [vmem:[#allocation5 + $0x70] sm:$0xff]   ;;  %v50_v22 = vld [vmem:[#allocation3] sm:$0xff] }
  0x2d   :  { %1074 = vmatpush3.bf16.msra.mxu0 %v1236_v5  ;;  %1167 = vmatpush3.bf16.msra.mxu1 %v1237_v6  ;;  %v1251_v20 = vld [vmem:[#allocation5 + $0x30] sm:$0xff]   ;;  %v1253_v23 = vld [vmem:[#allocation5 + $0x78] sm:$0xff]   ;;  %v982_v24 = vcombine.high %v50_v22, %v50_v22  ;;  %v1258_v27 = vld [vmem:[#allocation5 + $0x100] sm:$0xff]   ;;  %v981_v29 = vcombine.low %v50_v22, %v50_v22 }
  0x2e   :  { %1075 = vmatprep.subr.bf16.mxu0 %v1238_v7  ;;  %1168 = vmatprep.subr.bf16.mxu1 %v1367_v0  ;;  %v1252_v21 = vld [vmem:[#allocation5 + $0xb0] sm:$0xff]   ;;  %v1254_v25 = vld [vmem:[#allocation5 + $0x38] sm:$0xff]   ;;  %v1259_v28 = vld [vmem:[#allocation5 + $0xc0] sm:$0xff]  }
  0x2f   :  { %294 = vmatprep.mubr.bf16.mxu0 %v982_v24  ;;  %v1257_v26 = vld [vmem:[#allocation5 + $0xb8] sm:$0xff]   ;;  %v1260_v30 = vld [vmem:[#allocation3 + $0x8] ss:$0 sps:$4 sm:$0xff]   ;;  %v1262_v32 = vld [vmem:[#allocation5 + $0x108] sm:$0xff]  }
  0x30   :  { %v1261_v31 = vld [vmem:[#allocation5 + $0x140] sm:$0xff]   ;;  %v1263_v33 = vld [vmem:[#allocation5 + $0xc8] sm:$0xff]   ;;  %v1265_v35 = vld [vmem:[#allocation5 + $0x110] sm:$0xff]  }
  0x31   :  { %1076 = vmatpush3.bf16.msra.mxu0 %v1239_v8  ;;  %1169 = vmatpush3.bf16.msra.mxu1 %v1240_v9  ;;  %v1264_v34 = vld [vmem:[#allocation5 + $0x148] sm:$0xff]   ;;  %v1266_v36 = vld [vmem:[#allocation5 + $0xd0] sm:$0xff]   ;;  %v1268_v38 = vld [vmem:[#allocation5 + $0x118] sm:$0xff]  }
  0x32   :  { %1077 = vmatprep.subr.bf16.mxu0 %v1241_v10  ;;  %1170 = vmatprep.subr.bf16.mxu1 %v1367_v0  ;;  %v1267_v37 = vld [vmem:[#allocation5 + $0x150] sm:$0xff]   ;;  %v1269_v39 = vld [vmem:[#allocation5 + $0xd8] sm:$0xff]   ;;  %v1271_v41 = vld [vmem:[#allocation5 + $0x120] sm:$0xff]  }
  0x33   :  { %v1270_v40 = vld [vmem:[#allocation5 + $0x158] sm:$0xff]   ;;  %v1272_v42 = vld [vmem:[#allocation5 + $0xe0] sm:$0xff]   ;;  %v1274_v44 = vld [vmem:[#allocation5 + $0x128] sm:$0xff]  }
  0x34   :  { %v1273_v43 = vld [vmem:[#allocation5 + $0x160] sm:$0xff]   ;;  %v354_v45 = vld [vmem:[#allocation3 + $0xc] sm:$0xff]  ;;  %v1277_v49 = vld [vmem:[#allocation5 + $0x130] sm:$0xff]  }
  0x35   :  { %1078 = vmatpush3.bf16.msra.mxu0 %v1242_v11  ;;  %1171 = vmatpush3.bf16.msra.mxu1 %v1243_v12  ;;  %v1012_v46 = vcombine.high %v354_v45, %v354_v45  ;;  %v1275_v47 = vld [vmem:[#allocation5 + $0xe8] sm:$0xff]   ;;  %v1278_v50 = vld [vmem:[#allocation5 + $0xf0] sm:$0xff]   ;;  %v1280_v52 = vld [vmem:[#allocation5 + $0x138] sm:$0xff]   ;;  %v1011_v57 = vcombine.low %v354_v45, %v354_v45 }
  0x36   :  { %1079 = vmatprep.subr.bf16.mxu0 %v1244_v13  ;;  %1172 = vmatprep.subr.bf16.mxu1 %v1367_v0  ;;  %v1276_v48 = vld [vmem:[#allocation5 + $0x168] sm:$0xff]   ;;  %v1279_v51 = vld [vmem:[#allocation5 + $0x170] sm:$0xff]   ;;  %v1281_v53 = vld [vmem:[#allocation5 + $0xf8] sm:$0xff]  }
  0x37   :  { %v1284_v54 = vld [vmem:[#allocation5 + $0x178] sm:$0xff]   ;;  %v1285_v55 = vld [vmem:[#allocation5 + $0x1c0] sm:$0xff]   ;;  %v1287_v58 = vld [vmem:[#allocation3 + $0x14] ss:$0 sps:$4 sm:$0xff]  }
  0x38   :  { %v1286_v56 = vld [vmem:[#allocation5 + $0x180] sm:$0xff]   ;;  %v1289_v60 = vld [vmem:[#allocation5 + $0x1c8] sm:$0xff]   ;;  %v1292_v63 = vld [vmem:[#allocation5 + $0x1d0] sm:$0xff]  }
  0x39   :  { %1080 = vmatpush3.bf16.msra.mxu0 %v1245_v14  ;;  %1173 = vmatpush3.bf16.msra.mxu1 %v1246_v15  ;;  %v1288_v59 = vld [vmem:[#allocation5 + $0x200] sm:$0xff]   ;;  %v1290_v61 = vld [vmem:[#allocation5 + $0x188] sm:$0xff]   ;;  %v1293_v1 = vld [vmem:[#allocation5 + $0x190] sm:$0xff]  }
  0x3a   :  { %1081 = vmatprep.subr.bf16.mxu0 %v1247_v16  ;;  %1174 = vmatprep.subr.bf16.mxu1 %v1367_v0  ;;  %v1291_v62 = vld [vmem:[#allocation5 + $0x208] sm:$0xff]   ;;  %v1294_v2 = vld [vmem:[#allocation5 + $0x210] sm:$0xff]   ;;  %v1295_v3 = vld [vmem:[#allocation5 + $0x1d8] sm:$0xff]  }
  0x3b   :  { %v662_v4 = vld [vmem:[#allocation3 + $0x18] sm:$0xff]  ;;  %v1298_v8 = vld [vmem:[#allocation5 + $0x1e0] sm:$0xff]   ;;  %v1301_v11 = vld [vmem:[#allocation5 + $0x1e8] sm:$0xff]  }
  0x3c   :  { %v1043_v5 = vcombine.high %v662_v4, %v662_v4  ;;  %v1296_v6 = vld [vmem:[#allocation5 + $0x198] sm:$0xff]   ;;  %v1299_v9 = vld [vmem:[#allocation5 + $0x1a0] sm:$0xff]   ;;  %v1302_v12 = vld [vmem:[#allocation5 + $0x1a8] sm:$0xff]  }
  0x3d   :  { %1082 = vmatpush3.bf16.msra.mxu0 %v1248_v17  ;;  %1175 = vmatpush3.bf16.msra.mxu1 %v1249_v18  ;;  %v1297_v7 = vld [vmem:[#allocation5 + $0x218] sm:$0xff]   ;;  %v1300_v10 = vld [vmem:[#allocation5 + $0x220] sm:$0xff]   ;;  %v1303_v13 = vld [vmem:[#allocation5 + $0x228] sm:$0xff]  }
  0x3e   :  { %1083 = vmatprep.subr.bf16.mxu0 %v1250_v19  ;;  %1176 = vmatprep.subr.bf16.mxu1 %v1367_v0  ;;  %v1304_v14 = vld [vmem:[#allocation5 + $0x1f0] sm:$0xff]   ;;  %v1307_v17 = vld [vmem:[#allocation5 + $0x1f8] sm:$0xff]  }
  0x3f   :  { %v1305_v15 = vld [vmem:[#allocation5 + $0x1b0] sm:$0xff]   ;;  %v1308_v18 = vld [vmem:[#allocation5 + $0x1b8] sm:$0xff]  }
  0x40   :  { %v1306_v16 = vld [vmem:[#allocation5 + $0x230] sm:$0xff]   ;;  %v1311_v19 = vld [vmem:[#allocation5 + $0x238] sm:$0xff]  }
  0x41   :  { %1084 = vmatpush3.bf16.msra.mxu0 %v1251_v20  ;;  %1177 = vmatpush3.bf16.msra.mxu1 %v1252_v21  ;;  %v1042_v20 = vcombine.low %v662_v4, %v662_v4  ;;  %v1312_v21 = vld [vmem:[#allocation3 + $0x20] ss:$0 sps:$4 sm:$0xff]  }
  0x42   :  { %1085 = vmatprep.subr.bf16.mxu0 %v1253_v23  ;;  %1178 = vmatprep.subr.bf16.mxu1 %v1367_v0  ;;  %v980_v24 = vld [vmem:[%s1479_s2] ss:$0 sm:$0xff] }
  0x45   :  { %1086 = vmatpush3.bf16.msra.mxu0 %v1254_v25  ;;  %1179 = vmatpush3.bf16.msra.mxu1 %v1257_v26 }
  0x46   :  { %1102 = vmatprep.subr.bf16.mxu0 %v1258_v27  ;;  %1184 = vmatprep.subr.bf16.mxu1 %v1367_v0 }
  0x48   :  { %295 = vmatmul.mubr.bf16.vlgmr.msra.gmra.mrb[0].mxu0 %v981_v29  ;;  %1181 = vmatmul.mubr.bf16.vlgmr.msra.gmra.mrb[0].mxu1 %v1260_v30 }
  0x49   :  { %1103 = vmatpush3.bf16.msra.mxu0 %v1259_v28  ;;  %1185 = vmatpush3.bf16.msra.mxu1 %v1261_v31 }
  0x4a   :  { %1104 = vmatprep.subr.bf16.mxu0 %v1262_v32  ;;  %1186 = vmatprep.subr.bf16.mxu1 %v1367_v0 }
  0x4b   :  { %1200 = vmatprep.mubr.msk.bf16.mxu1 %vm1368_vm0, %v1367_v0  ;;  %600 = vmatprep.mubr.bf16.mxu0 %v1012_v46 }
  0x4d   :  { %1105 = vmatpush3.bf16.msra.mxu0 %v1263_v33  ;;  %1187 = vmatpush3.bf16.msra.mxu1 %v1264_v34  ;;  %v1008_v33 = vld [vmem:[%s1480_s3] ss:$0 sm:$0xff] }
  0x4e   :  { %1106 = vmatprep.subr.bf16.mxu0 %v1265_v35  ;;  %1188 = vmatprep.subr.bf16.mxu1 %v1367_v0 }
  0x51   :  { %1107 = vmatpush3.bf16.msra.mxu0 %v1266_v36  ;;  %1189 = vmatpush3.bf16.msra.mxu1 %v1267_v37 }
  0x52   :  { %1108 = vmatprep.subr.bf16.mxu0 %v1268_v38  ;;  %1190 = vmatprep.subr.bf16.mxu1 %v1367_v0  ;;  %v1010_v38 = vld [vmem:[%s1479_s2 + $0x1] ss:$0 sm:$0xff] }
  0x55   :  { %1109 = vmatpush3.bf16.msra.mxu0 %v1269_v39  ;;  %1191 = vmatpush3.bf16.msra.mxu1 %v1270_v40 }
  0x56   :  { %1110 = vmatprep.subr.bf16.mxu0 %v1271_v41  ;;  %1192 = vmatprep.subr.bf16.mxu1 %v1367_v0 }
  0x59   :  { %1111 = vmatpush3.bf16.msra.mxu0 %v1272_v42  ;;  %1193 = vmatpush3.bf16.msra.mxu1 %v1273_v43 }
  0x5a   :  { %1112 = vmatprep.subr.bf16.mxu0 %v1274_v44  ;;  %1194 = vmatprep.subr.bf16.mxu1 %v1367_v0 }
  0x5d   :  { %1113 = vmatpush3.bf16.msra.mxu0 %v1275_v47  ;;  %1195 = vmatpush3.bf16.msra.mxu1 %v1276_v48  ;;  %v1039_v48 = vld [vmem:[%s1480_s3 + $0x1] ss:$0 sm:$0xff] }
  0x5e   :  { %1114 = vmatprep.subr.bf16.mxu0 %v1277_v49  ;;  %1196 = vmatprep.subr.bf16.mxu1 %v1367_v0 }
  0x61   :  { %1115 = vmatpush3.bf16.msra.mxu0 %v1278_v50  ;;  %1197 = vmatpush3.bf16.msra.mxu1 %v1279_v51 }
  0x62   :  { %1116 = vmatprep.subr.bf16.mxu0 %v1280_v52  ;;  %1198 = vmatprep.subr.bf16.mxu1 %v1367_v0 }
  0x65   :  { %1117 = vmatpush3.bf16.msra.mxu0 %v1281_v53  ;;  %1199 = vmatpush3.bf16.msra.mxu1 %v1284_v54  ;;  %v1041_v53 = vld [vmem:[%s1479_s2 + $0x2] ss:$0 sm:$0xff] }
  0x66   :  { %1133 = vmatprep.subr.bf16.mxu0 %v1285_v55  ;;  %1204 = vmatprep.subr.bf16.mxu1 %v1367_v0 }
  0x68   :  { %601 = vmatmul.mubr.bf16.vlgmr.msra.gmra.mrb[4].mxu0 %v1011_v57  ;;  %1201 = vmatmul.mubr.bf16.vlgmr.msra.gmra.mrb[4].mxu1 %v1287_v58 }
  0x69   :  { %1134 = vmatpush3.bf16.msra.mxu0 %v1286_v56  ;;  %1205 = vmatpush3.bf16.msra.mxu1 %v1288_v59 }
  0x6a   :  { %1135 = vmatprep.subr.bf16.mxu0 %v1289_v60  ;;  %1206 = vmatprep.subr.bf16.mxu1 %v1367_v0 }
  0x6b   :  { %1220 = vmatprep.mubr.msk.bf16.mxu1 %vm1368_vm0, %v1367_v0  ;;  %908 = vmatprep.mubr.bf16.mxu0 %v1043_v5 }
  0x6d   :  { %1136 = vmatpush3.bf16.msra.mxu0 %v1290_v61  ;;  %1207 = vmatpush3.bf16.msra.mxu1 %v1291_v62 }
  0x6e   :  { %1137 = vmatprep.subr.bf16.mxu0 %v1292_v63  ;;  %1208 = vmatprep.subr.bf16.mxu1 %v1367_v0  ;;  %v1070_v63 = vld [vmem:[%s1480_s3 + $0x2] ss:$0 sm:$0xff] }
  0x71   :  { %1138 = vmatpush3.bf16.msra.mxu0 %v1293_v1  ;;  %1209 = vmatpush3.bf16.msra.mxu1 %v1294_v2 }
  0x72   :  { %1139 = vmatprep.subr.bf16.mxu0 %v1295_v3  ;;  %1210 = vmatprep.subr.bf16.mxu1 %v1367_v0 }
  0x75   :  { %1140 = vmatpush3.bf16.msra.mxu0 %v1296_v6  ;;  %1211 = vmatpush3.bf16.msra.mxu1 %v1297_v7  ;;  %v970_v6 = vstv %s1481_s4 }
  0x76   :  { %1141 = vmatprep.subr.bf16.mxu0 %v1298_v8  ;;  %1212 = vmatprep.subr.bf16.mxu1 %v1367_v0 }
  0x79   :  { %1142 = vmatpush3.bf16.msra.mxu0 %v1299_v9  ;;  %1213 = vmatpush3.bf16.msra.mxu1 %v1300_v10 }
  0x7a   :  { %1143 = vmatprep.subr.bf16.mxu0 %v1301_v11  ;;  %1214 = vmatprep.subr.bf16.mxu1 %v1367_v0 }
  0x7d   :  { %1144 = vmatpush3.bf16.msra.mxu0 %v1302_v12  ;;  %1215 = vmatpush3.bf16.msra.mxu1 %v1303_v13 }
  0x7e   :  { %1145 = vmatprep.subr.bf16.mxu0 %v1304_v14  ;;  %1216 = vmatprep.subr.bf16.mxu1 %v1367_v0 }
  0x81   :  { %1146 = vmatpush3.bf16.msra.mxu0 %v1305_v15  ;;  %1217 = vmatpush3.bf16.msra.mxu1 %v1306_v16 }
  0x82   :  { %1147 = vmatprep.subr.bf16.mxu0 %v1307_v17  ;;  %1218 = vmatprep.subr.bf16.mxu1 %v1367_v0 }
  0x85   :  { %1148 = vmatpush3.bf16.msra.mxu0 %v1308_v18  ;;  %1219 = vmatpush3.bf16.msra.mxu1 %v1311_v19 }
  0x88   :  { %909 = vmatmul.mubr.bf16.vlgmr.msra.gmra.mrb[8].mxu0 %v1042_v20  ;;  %1221 = vmatmul.mubr.bf16.vlgmr.msra.gmra.mrb[8].mxu1 %v1312_v21 }
 0x11b   :  { %v1087_v22 = vpop.f32.mrb[0].mxu0  ;;  %v336_v25 = vpop.f32.mrb[0].mxu1 }
 0x11c   :  { %v1088_v23 = vpop.f32.mrb[1].mxu0  ;;  %v1182_v28 = vpop.f32.mrb[1].mxu1 }
 0x11d   :  { %v1089_v26 = vadd.f32 %v1088_v23, %v1087_v22  ;;  %v1090_v27 = vpop.f32.mrb[2].mxu0  ;;  %v339_v30 = vpop.f32.mrb[2].mxu1 }
 0x11e   :  { %v1091_v29 = vpop.f32.mrb[3].mxu0  ;;  %v1183_v0 = vpop.f32.mrb[3].mxu1 }
 0x11f   :  { %v297_v31 = vadd.f32 %v1089_v26, %v980_v24 }
 0x121   :  { %v337_v32 = vadd.f32 %v336_v25, %v297_v31 }
 0x123   :  { %v342_v34 = vmax.f32 %v337_v32, 0.0 }
 0x125   :  { %v350_v35 = vmul.f32 %v1008_v33, %v342_v34 }
 0x127   :  { %351 = vadd.xlane.f32.xlu0 %v350_v35 }
 0x13b   :  { %v1118_v36 = vpop.f32.mrb[4].mxu0  ;;  %v642_v39 = vpop.f32.mrb[4].mxu1 }
 0x13c   :  { %v1119_v37 = vpop.f32.mrb[5].mxu0  ;;  %v1202_v42 = vpop.f32.mrb[5].mxu1 }
 0x13d   :  { %v1120_v40 = vadd.f32 %v1119_v37, %v1118_v36  ;;  %v1121_v41 = vpop.f32.mrb[6].mxu0  ;;  %v645_v44 = vpop.f32.mrb[6].mxu1 }
 0x13e   :  { %v1122_v43 = vpop.f32.mrb[7].mxu0  ;;  %v1203_v46 = vpop.f32.mrb[7].mxu1 }
 0x13f   :  { %v603_v45 = vadd.f32 %v1120_v40, %v1010_v38 }
 0x141   :  { %v643_v47 = vadd.f32 %v642_v39, %v603_v45 }
 0x143   :  { %v648_v49 = vmax.f32 %v643_v47, 0.0 }
 0x145   :  { %v657_v50 = vmul.f32 %v1039_v48, %v648_v49 }
 0x147   :  { %658 = vadd.xlane.f32.xlu0 %v657_v50 }
 0x15b   :  { %v1149_v51 = vpop.f32.mrb[8].mxu0  ;;  %v950_v54 = vpop.f32.mrb[8].mxu1 }
 0x15c   :  { %v1150_v52 = vpop.f32.mrb[9].mxu0  ;;  %v1222_v57 = vpop.f32.mrb[9].mxu1 }
 0x15d   :  { %v1151_v55 = vadd.f32 %v1150_v52, %v1149_v51  ;;  %v1152_v56 = vpop.f32.mrb[10].mxu0  ;;  %v953_v59 = vpop.f32.mrb[10].mxu1 }
 0x15e   :  { %v1153_v58 = vpop.f32.mrb[11].mxu0  ;;  %v1223_v61 = vpop.f32.mrb[11].mxu1 }
 0x15f   :  { %v911_v60 = vadd.f32 %v1151_v55, %v1041_v53 }
 0x161   :  { %v951_v62 = vadd.f32 %v950_v54, %v911_v60 }
 0x163   :  { %v956_v1 = vmax.f32 %v951_v62, 0.0 }
 0x165   :  { %v965_v2 = vmul.f32 %v1070_v63, %v956_v1 }
 0x167   :  { %966 = vadd.xlane.f32.xlu1 %v965_v2 }
 0x1b4   :  { %v352_v3 = vpop.xlane.xlu0 %351 }
 0x1d4   :  { %v659_v4 = vpop.xlane.xlu0 %658 }
 0x1d5   :  { %v660_v5 = vadd.f32 %v659_v4, %v352_v3 }
 0x1f4   :  { %v967_v7 = vpop.xlane.xlu1 %966 }
 0x1f5   :  { %v968_v8 = vadd.f32 %v967_v7, %v660_v5 }
 0x1f7   :  { %v971_v9 = vadd.f32 %v970_v6, %v968_v8 }
 0x1f9   :  { %973 = vst.msk [vmem:[%s1482_s5] sm:$0xff] %vm972_vm1, %v971_v9 }
 0x1fa   :  { %978 = vsyncpa [#allocation4], 1 }
 0x1fb   :  { %979 = vsyncpa [#allocation6], 1 }

</bundles_post_ra>
